<compile_context>
chip_gen: v7x
topology: tpu7x:2x2x1
jax: 0.10.0
libtpu: 0.0.40
codegen_flags: <defaults>
</compile_context>

<pallas_src>
import functools
import math

import jax
import jax.numpy as jnp
from jax.experimental import pallas as pl
from jax.experimental.pallas import tpu as pltpu


def gem_kernel(p_ref, x_ref, o_ref, acc_ref, *, eps, hw_total):
    """One (row-tile, spatial-chunk) grid step of GeM pooling.

    p_ref   : SMEM (1,) scalar-prefetched GeM exponent
    x_ref   : VMEM (TILE_R, TILE_K) input chunk
    o_ref   : VMEM (TILE_R, 1) output tile (written on the last k step)
    acc_ref : VMEM (TILE_R, 1) f32 running sum of x**p over the spatial axis
    """
    k = pl.program_id(1)

    @pl.when(k == 0)
    def _():
        acc_ref[...] = jnp.zeros_like(acc_ref)

    p = p_ref[0]
    x = jnp.maximum(x_ref[...].astype(jnp.float32), eps)       # clamp(min=eps)
    # x ** p with exactly one log + one exp per element (x > 0 after clamp).
    xp = jnp.exp(p * jnp.log(x))
    acc_ref[...] += jnp.sum(xp, axis=-1, keepdims=True)

    @pl.when(k == pl.num_programs(1) - 1)
    def _():
        inv_p = 1.0 / p
        # mean ** (1/p) == exp((log(sum) - log(HW)) * (1/p)); log(HW) is a
        # compile-time constant, so only one log + one exp per output element.
        o_ref[...] = jnp.exp(
            (jnp.log(acc_ref[...]) - math.log(hw_total)) * inv_p
        ).astype(o_ref.dtype)


def gem(x, p, eps=1e-6, *, max_tile_k=2048, max_block_bytes=4 << 20):
    """GeM pooling. x: (N, C, H, W), p: (1,) -> (N, C, 1, 1)."""
    N, C, H, W = x.shape
    R, HW = N * C, H * W
    x2 = x.reshape(R, HW)

    # ---- spatial (reduction) tiling: only chunk when HW is large & 128-aligned.
    if HW > max_tile_k and HW % 128 == 0:
        tile_k = 128
        for cand in range(min(max_tile_k, HW), 127, -128):
            if HW % cand == 0:
                tile_k = cand
                break
    else:
        tile_k = HW                       # full spatial extent in one block
    num_k = HW // tile_k

    # ---- row tiling: keep each (tile_r, tile_k) f32 block <= max_block_bytes.
    # The pipeline double-buffers it (2x in VMEM), which stays well within the
    # scoped-VMEM defaults on v5e (16 MiB), v6e (32 MiB) and v7x (32 MiB).
    max_block_elems = max(1, max_block_bytes // 4)
    tile_r_cap = max(8, (max_block_elems // tile_k) // 8 * 8)
    if R <= tile_r_cap:
        tile_r, r_pad = R, R              # single row tile, no padding needed
    else:
        tile_r = min(512, tile_r_cap)
        r_pad = pl.cdiv(R, tile_r) * tile_r
    num_r = r_pad // tile_r

    if r_pad != R:
        # Padded rows are benign (value 1.0 -> finite log/exp) and discarded.
        x2 = jnp.pad(x2, ((0, r_pad - R), (0, 0)), constant_values=1.0)

    grid_spec = pltpu.PrefetchScalarGridSpec(
        num_scalar_prefetch=1,            # p lands in SMEM, untiled
        grid=(num_r, num_k),
        in_specs=[pl.BlockSpec((tile_r, tile_k), lambda i, k, p_ref: (i, k))],
        out_specs=pl.BlockSpec((tile_r, 1), lambda i, k, p_ref: (i, 0)),
        scratch_shapes=[pltpu.VMEM((tile_r, 1), jnp.float32)],
    )

    out = pl.pallas_call(
        functools.partial(gem_kernel, eps=eps, hw_total=HW),
        out_shape=jax.ShapeDtypeStruct((r_pad, 1), x.dtype),
        grid_spec=grid_spec,
        compiler_params=pltpu.CompilerParams(
            dimension_semantics=("parallel", "arbitrary")),
        cost_estimate=pl.CostEstimate(
            flops=3 * R * HW,
            transcendentals=2 * R * HW,
            bytes_accessed=4 * R * HW + 4 * R),
    )(p, x2)

    return out[:R].reshape(N, C, 1, 1)


def gem_ref(x, p, eps=1e-6):
    """Plain-JAX reference matching the PyTorch module."""
    xp = jnp.maximum(x, eps) ** p[0]
    return jnp.mean(xp, axis=(-2, -1), keepdims=True) ** (1.0 / p[0])


if __name__ == "__main__":
    key = jax.random.PRNGKey(0)
    eps = 1e-6
    # Deterministic parameter init, matching nn.Parameter(torch.ones(1) * p), p=3.
    p_param = jnp.ones((1,), dtype=jnp.float32) * 3.0

    # --- test 1: small shape, single block path -----------------------------
    N, C, H, W = 2, 4, 16, 16
    x = jax.random.normal(key, (N, C, H, W), dtype=jnp.float32)
    y = gem(x, p_param, eps=eps)
    jax.block_until_ready(y)
    ref = gem_ref(x, p_param, eps=eps)
    assert y.shape == (N, C, 1, 1)
    assert jnp.allclose(y, ref, rtol=1e-4, atol=1e-6)

    # --- test 2: forced 2-D grid (row tiling + spatial reduction + padding) --
    N2, C2, H2, W2 = 3, 10, 16, 16       # R=30 rows -> padded to 32, 4 row tiles
    x2 = jax.random.normal(jax.random.PRNGKey(1), (N2, C2, H2, W2),
                           dtype=jnp.float32)
    y2 = gem(x2, p_param, eps=eps, max_tile_k=128, max_block_bytes=8 * 128 * 4)
    jax.block_until_ready(y2)
    ref2 = gem_ref(x2, p_param, eps=eps)
    assert y2.shape == (N2, C2, 1, 1)
    assert jnp.allclose(y2, ref2, rtol=1e-4, atol=1e-6)

    print("KERNEL_OK")
</pallas_src>

<mosaic_0001>
module attributes {stable_mosaic.version = 11 : i64} {
  func.func @gem_kernel(%arg0: i32, %arg1: i32, %arg2: memref<1xf32, #tpu.memory_space<smem>>, %arg3: memref<8x256xf32, #tpu.memory_space<vmem>>, %arg4: memref<8x1xf32, #tpu.memory_space<vmem>>, %arg5: memref<8x1xf32, #tpu.memory_space<vmem>>) attributes {dimension_semantics = [#tpu.dimension_semantics<parallel>, #tpu.dimension_semantics<arbitrary>], iteration_bounds = array<i64: 1, 1>, scalar_prefetch = 1 : i64, scratch_operands = 1 : i64, tpu.core_type = #tpu.core_type<tc>, window_params = [{transform_indices = @transform_0, window_bounds = array<i64: 8, 256>}, {transform_indices = @transform_1, window_bounds = array<i64: 8, 1>}]} {
    %c0_i32 = arith.constant 0 : i32
    %0 = arith.cmpi eq, %arg1, %c0_i32 : i32
    %1 = arith.extui %0 : i1 to i32
    %c0_i32_0 = arith.constant 0 : i32
    %2 = arith.cmpi ne, %1, %c0_i32_0 : i32
    scf.if %2 {
      %cst_10 = arith.constant 0.000000e+00 : f32
      %19 = vector.broadcast %cst_10 : f32 to vector<8x1xf32>
      %c0_11 = arith.constant 0 : index
      %c0_12 = arith.constant 0 : index
      %20 = vector.load %arg5[%c0_11, %c0_12] : memref<8x1xf32, #tpu.memory_space<vmem>>, vector<8x1xf32>
      tpu.vector_store %arg5[%c0_11, %c0_12], %19 {strides = array<i32>} : memref<8x1xf32, #tpu.memory_space<vmem>>, vector<8x1xf32>,
    } else {
    }
    %c0 = arith.constant 0 : index
    %3 = memref.load %arg2[%c0] : memref<1xf32, #tpu.memory_space<smem>>
    %c0_1 = arith.constant 0 : index
    %c0_2 = arith.constant 0 : index
    %4 = vector.load %arg3[%c0_1, %c0_2] : memref<8x256xf32, #tpu.memory_space<vmem>>, vector<8x256xf32>
    %cst = arith.constant 9.99999997E-7 : f32
    %5 = vector.broadcast %cst : f32 to vector<8x256xf32>
    %6 = arith.maximumf %4, %5 : vector<8x256xf32>
    %7 = math.log %6 : vector<8x256xf32>
    %8 = vector.broadcast %3 : f32 to vector<8x256xf32>
    %9 = arith.mulf %8, %7 : vector<8x256xf32>
    %10 = math.exp %9 : vector<8x256xf32>
    %c0_3 = arith.constant 0 : index
    %c0_4 = arith.constant 0 : index
    %11 = vector.load %arg5[%c0_3, %c0_4] : memref<8x1xf32, #tpu.memory_space<vmem>>, vector<8x1xf32>
    %cst_5 = arith.constant dense<0.000000e+00> : vector<8xf32>
    %12 = vector.multi_reduction <add>, %10, %cst_5 [1] : vector<8x256xf32> to vector<8xf32>
    %13 = vector.shape_cast %12 : vector<8xf32> to vector<8x1xf32>
    %14 = arith.addf %11, %13 : vector<8x1xf32>
    %c0_6 = arith.constant 0 : index
    %c0_7 = arith.constant 0 : index
    %15 = vector.load %arg5[%c0_6, %c0_7] : memref<8x1xf32, #tpu.memory_space<vmem>>, vector<8x1xf32>
    tpu.vector_store %arg5[%c0_6, %c0_7], %14 {strides = array<i32>} : memref<8x1xf32, #tpu.memory_space<vmem>>, vector<8x1xf32>,
    %c0_i32_8 = arith.constant 0 : i32
    %16 = arith.cmpi eq, %arg1, %c0_i32_8 : i32
    %17 = arith.extui %16 : i1 to i32
    %c0_i32_9 = arith.constant 0 : i32
    %18 = arith.cmpi ne, %17, %c0_i32_9 : i32
    scf.if %18 {
      %cst_10 = arith.constant 1.000000e+00 : f32
      %19 = arith.divf %cst_10, %3 : f32
      %c0_11 = arith.constant 0 : index
      %c0_12 = arith.constant 0 : index
      %20 = vector.load %arg5[%c0_11, %c0_12] : memref<8x1xf32, #tpu.memory_space<vmem>>, vector<8x1xf32>
      %21 = math.log %20 : vector<8x1xf32>
      %cst_13 = arith.constant 5.54517746 : f32
      %22 = vector.broadcast %cst_13 : f32 to vector<8x1xf32>
      %23 = arith.subf %21, %22 : vector<8x1xf32>
      %24 = vector.broadcast %19 : f32 to vector<8x1xf32>
      %25 = arith.mulf %23, %24 : vector<8x1xf32>
      %26 = math.exp %25 : vector<8x1xf32>
      %c0_14 = arith.constant 0 : index
      %c0_15 = arith.constant 0 : index
      %27 = vector.load %arg4[%c0_14, %c0_15] : memref<8x1xf32, #tpu.memory_space<vmem>>, vector<8x1xf32>
      tpu.vector_store %arg4[%c0_14, %c0_15], %26 {strides = array<i32>} : memref<8x1xf32, #tpu.memory_space<vmem>>, vector<8x1xf32>,
    } else {
    }
    return
  }
  func.func @transform_0(%arg0: i32, %arg1: i32, %arg2: memref<1xf32, #tpu.memory_space<smem>>) -> (i32, i32) {
    %c0_i32 = arith.constant 0 : i32
    return %arg0, %arg1 : i32, i32
  }
  func.func @transform_1(%arg0: i32, %arg1: i32, %arg2: memref<1xf32, #tpu.memory_space<smem>>) -> (i32, i32) {
    %c0_i32 = arith.constant 0 : i32
    %c0_i32_0 = arith.constant 0 : i32
    return %arg0, %c0_i32 : i32, i32
  }
}

</mosaic_0001>

<bundles_post_ra>
// kernel: tpu_custom_call.1
= control target key start
LH: loop header
LB: loop body
LE: loop exit
PB: predicated region body
PF: predicated region fallthrough
CT: control target
= control target key end

     0   :  { %8 = vsyncpa [#allocation6], 0  ;;  %s114_s9 = smov [#allocation5]   ;;  %s152_s0 = inlined_call_operand.<no memory space> [shape: f32[1], index: 0, kind: input, shape index: {}]   ;;  %s153_s1 = inlined_call_operand.hbm [shape: f32[8,256], index: 1, kind: input, shape index: {}]   ;;  %s154_s2 = inlined_call_operand.vmem [shape: f32[8,1], index: 2, kind: output, shape index: {}]  }
   0x1   :  { %s15_s10 = sshll.u32 %s114_s9, 4  ;;  %s90_s13 = scalar_lea.hbm %s153_s1, 256  ;;  %s16_s10 = int_to_ptr.vmem [resolvable:$true] %s15_s10 }
   0x2   :  { %p91_p0 = scmp.ne.s32.totalorder %s153_s1, %s90_s13  ;;  %p94_p1 = scmp.lt.u32.totalorder %s90_s13, %s153_s1 }
   0x4   :  { %p96_p2 = pnand %p94_p1, %p91_p0 }
   0x6   :  { %99 = shalt.err (!%p96_p2)
}
   0x7   :  { %s100_s18 = scalar_lea.vmem %s16_s10, 256  ;;  %p105_p4 = scmp.lt.s32.totalorder %s16_s10, %s16_s10 }
   0x8   :  { %p101_p3 = scmp.ne.s32.totalorder %s16_s10, %s100_s18  ;;  %p106_p5 = scmp.lt.s32.totalorder %s100_s18, %s100_s18 }
   0xa   :  { %p107_p6 = por %p106_p5, %p105_p4 }
   0xc   :  { %p108_p7 = pnand %p107_p6, %p101_p3 }
   0xe   :  { %111 = shalt.err (!%p108_p7)
}
   0xf   :  { %18 = dma.hbm_to_vmem [thread:$0]  %s153_s1, 256, %s16_s10, [#allocation6]  }
  0x10   :  { %112 = dma.done.wait [#allocation6], 256  }
  0x11   :  { %113 = vsyncadd [#allocation6], 4294967040  ;;  %vm26_vm0 = vcmask 7168   ;;  %v37_v0 = vstv %s152_s0  ;;  %v115_v1 = vmov 0.0   ;;  %v29_v2 = vld [vmem:[#allocation5] sm:$0xff]  ;;  %v30_v3 = vld [vmem:[#allocation5 + $0x8] sm:$0xff] }
  0x12   :  { %27 = vst.msk [vmem:[#allocation2] sm:$0xff] %vm26_vm0, %v115_v1  ;;  %76 = vrcp.f32 %v37_v0  ;;  %v31_v4 = vmax.f32 %v29_v2, 1e-06  ;;  %v32_v5 = vmax.f32 %v30_v3, 1e-06 }
  0x14   :  { %78 = vlog2.f32 %v31_v4 }
  0x15   :  { %80 = vlog2.f32 %v32_v5 }
  0x19   :  { %v44_v18 = vld [vmem:[#allocation2] sm:$0xff] }
  0x1c   :  { %v77_v6 = vpop.eup %76 }
  0x1d   :  { %72 = vpush %v77_v6 }
  0x1e   :  { %v79_v7 = vpop.eup %78 }
  0x1f   :  { %v81_v8 = vpop.eup %80  ;;  %v34_v9 = vmul.f32 0.6931472, %v79_v7 }
  0x20   :  { %v36_v10 = vmul.f32 0.6931472, %v81_v8 }
  0x21   :  { %v38_v11 = vmul.f32 %v37_v0, %v34_v9 }
  0x22   :  { %v39_v12 = vmul.f32 %v37_v0, %v36_v10 }
  0x23   :  { %v40_v13 = vmul.f32 1.442695, %v38_v11 }
  0x24   :  { %v42_v14 = vmul.f32 1.442695, %v39_v12 }
  0x25   :  { %82 = vpow2.f32 %v40_v13 }
  0x26   :  { %84 = vpow2.f32 %v42_v14 }
  0x2f   :  { %v83_v15 = vpop.eup %82 }
  0x30   :  { %v85_v16 = vpop.eup %84 }
  0x31   :  { %v45_v17 = vadd.f32 %v85_v16, %v83_v15 }
  0x33   :  { %46 = vadd.xlane.f32.xlu0 %v45_v17 }
  0x4e   :  { %s73_s0 = spop %72 }
  0x4f   :  { %v61_v24 = vstv %s73_s0 }
  0xc0   :  { %v47_v19 = vpop.xlane.xlu0 %46 }
  0xc1   :  { %v48_v20 = vadd.f32 %v47_v19, %v44_v18 }
  0xc3   :  { %50 = vst.msk [vmem:[#allocation2] sm:$0xff] %vm26_vm0, %v48_v20 }
  0xca   :  { %v57_v21 = vld [vmem:[#allocation2] sm:$0xff] }
  0xcb   :  { %86 = vlog2.f32 %v57_v21 }
  0xd5   :  { %v87_v22 = vpop.eup %86 }
  0xd6   :  { %v59_v23 = vmul.f32 0.6931472, %v87_v22 }
  0xd8   :  { %v71_v25 = vadd.f32 -5.5451775, %v59_v23 }
  0xda   :  { %v62_v26 = vmul.f32 %v71_v25, %v61_v24 }
  0xdc   :  { %v63_v27 = vmul.f32 1.442695, %v62_v26 }
  0xde   :  { %88 = vpow2.f32 %v63_v27 }
  0xe8   :  { %v89_v28 = vpop.eup %88 }
  0xe9   :  { %65 = vst.msk [vmem:[%s154_s2] sm:$0xff] %vm26_vm0, %v89_v28 }
  0xea   :  { %70 = vsyncpa [#allocation6], 1 }

</bundles_post_ra>
